<compile_context>
chip_gen: v7x
topology: tpu7x:2x2x1
jax: 0.10.0
libtpu: 0.0.40
codegen_flags: <defaults>
</compile_context>

<pallas_src>
import jax
import jax.numpy as jnp
from jax.experimental import pallas as pl
from jax.experimental.pallas import tpu as pltpu


def temporal_attention_kernel(x_ref, wt_ref, v_ref, o_ref):
    # x_ref:  (bblk*T, H) in the caller's dtype (usually f32) -- cast happens here
    #         in VMEM so x only crosses HBM once.
    # wt_ref: (H, H) compute dtype (bf16 or f32), W^T, grid-invariant.
    # v_ref:  (1, H) f32 row of v.weight, grid-invariant.
    # o_ref:  (bblk, T) softmax attention over time (lane-dense last dim T).
    bblk, t = o_ref.shape

    # One big MXU matmul over all bblk*T rows, f32 accumulation.
    xc = x_ref[...].astype(wt_ref.dtype)
    hid = jnp.tanh(jnp.dot(xc, wt_ref[...], preferred_element_type=jnp.float32))

    # energy = hid @ v^T done as a VPU multiply + lane (XLU) reduction: an
    # (rows, H) @ (H, 1) matmul would waste the MXU and 127/128 output lanes.
    energy_col = jnp.sum(hid * v_ref[...], axis=-1, keepdims=True)     # (rows, 1)
    # Only the scalar energies (bblk*T floats) get relaid out, not x or hid.
    energy = energy_col.reshape(bblk, t)                               # (bblk, T)

    # Numerically-stable softmax over the time axis (now the lane axis).
    # Exact divide so each row sums to 1, matching PyTorch's softmax.
    m = jnp.max(energy, axis=-1, keepdims=True)
    e = jnp.exp(energy - m)
    denom = jnp.sum(e, axis=-1, keepdims=True)
    o_ref[...] = (e / denom).astype(o_ref.dtype)


def _choose_block_batch(batch, time, hidden, itemsize, block_bytes):
    """Pick batch rows per grid step so the x block is ~block_bytes (MiB-scale
    blocks amortize the ~0.35 us fixed per-grid-step cost).
    Returns (bblk, num_blocks, padded_batch)."""
    row_bytes = max(1, time * hidden * itemsize)       # bytes of one batch row of x
    bblk = max(1, block_bytes // row_bytes)
    if bblk >= batch:
        return batch, 1, batch                         # whole problem in one step
    # Multiple grid steps: keep bblk a multiple of 8 so both the (bblk*T, H) x
    # block and the (bblk, T) output block satisfy the (8, 128) sublane rule and
    # the batch tail can be zero-padded instead of degrading to bblk == 1.
    bblk = (bblk // 8) * 8
    if bblk == 0:
        # A single batch row already exceeds the byte target (huge T*H).
        bblk = min(8, batch)
    if bblk >= batch:
        return batch, 1, batch
    nb = -(-batch // bblk)                             # ceil
    return bblk, nb, nb * bblk


def temporal_attention(encoder_outputs, w_weight, v_weight, *,
                       compute_dtype=jnp.bfloat16, block_bytes=2 * 1024 * 1024):
    """encoder_outputs: (B, T, H); w_weight: (H, H) [out, in]; v_weight: (1, H).

    Returns softmax attention weights of shape (B, T, 1) (PyTorch semantics).
    """
    B, T, H = encoder_outputs.shape
    out_dtype = encoder_outputs.dtype
    x_itemsize = jnp.dtype(encoder_outputs.dtype).itemsize
    c_itemsize = jnp.dtype(compute_dtype).itemsize

    bblk, nb, b_pad = _choose_block_batch(B, T, H, x_itemsize, block_bytes)
    rows_blk = bblk * T

    # x stays in its original dtype (the bf16 cast happens in-kernel; a wrapper
    # cast would add a full extra HBM pass). (B, T, H) -> (B*T, H) is a free
    # metadata reshape and removes all in-kernel reshapes of x / hid.
    x2d = encoder_outputs.reshape(B * T, H)
    if b_pad != B:
        # Zero rows -> finite uniform softmax in the padded tail, sliced off below.
        x2d = jnp.pad(x2d, ((0, (b_pad - B) * T), (0, 0)))

    wt = w_weight.T.astype(compute_dtype)              # (H, H), grid-invariant
    v_row = v_weight.reshape(1, H).astype(jnp.float32)  # (1, H), lane-dense
    # NOTE: H is used as-is; if H is not a multiple of 128 the MXU passes are
    # partially masked, but padding the contraction dim would multiply x's HBM
    # traffic (this kernel is HBM/overhead-bound), so we intentionally don't.

    # VMEM budget: double-buffered x block + W^T + v + output, plus the in-kernel
    # compute-dtype copy of x, the f32 hid and small softmax temporaries.
    est = (2 * rows_blk * H * x_itemsize               # x block (double-buffered)
           + rows_blk * H * c_itemsize                 # in-kernel cast of x
           + rows_blk * H * 4                          # f32 hid
           + 2 * H * H * c_itemsize + 2 * H * 4        # W^T + v (double-buffered)
           + 2 * rows_blk * 4                          # output block
           + 4 * rows_blk * 4)                         # energy / softmax temps
    try:
        vmem_cap = pltpu.get_tpu_info().vmem_capacity_bytes
    except Exception:
        vmem_cap = 64 * 2**20                          # assume smallest (v7x) VMEM
    vmem_limit = int(min(vmem_cap * 3 // 4, max(32 * 2**20, 2 * est)))

    cost = pl.CostEstimate(
        flops=2 * b_pad * T * H * H + 2 * b_pad * T * H + 5 * b_pad * T,
        transcendentals=b_pad * T * H + b_pad * T,     # tanh + exp
        bytes_accessed=(b_pad * T * H * x_itemsize + H * H * c_itemsize
                        + H * 4 + b_pad * T * jnp.dtype(out_dtype).itemsize),
    )

    attn = pl.pallas_call(
        temporal_attention_kernel,
        out_shape=jax.ShapeDtypeStruct((b_pad, T), out_dtype),
        grid_spec=pltpu.PrefetchScalarGridSpec(
            num_scalar_prefetch=0,
            grid=(nb,),
            in_specs=[
                pl.BlockSpec((rows_blk, H), lambda b: (b, 0)),
                pl.BlockSpec((H, H), lambda b: (0, 0)),    # grid-invariant weights
                pl.BlockSpec((1, H), lambda b: (0, 0)),    # grid-invariant v row
            ],
            out_specs=pl.BlockSpec((bblk, T), lambda b: (b, 0)),
        ),
        compiler_params=pltpu.CompilerParams(
            dimension_semantics=("parallel",),
            vmem_limit_bytes=vmem_limit,
        ),
        cost_estimate=cost,
    )(x2d, wt, v_row)

    # Free layout plumbing: (B_pad, T) -> (B, T, 1) (PyTorch returns (B, T, 1)).
    return attn[:B][:, :, None]


if __name__ == "__main__":
    key = jax.random.PRNGKey(0)
    kx, kw, kv, k2x, k2w, k2v = jax.random.split(key, 6)

    # ---- Shape 1: the module's small demo shape (single grid step) ----
    B, T, H = 2, 8, 32
    x = jax.random.normal(kx, (B, T, H), dtype=jnp.float32)
    # PyTorch Linear weight shapes: W.weight (H, H) [out, in], v.weight (1, H).
    w_weight = jax.random.normal(kw, (H, H), dtype=jnp.float32) * (1.0 / jnp.sqrt(H))
    v_weight = jax.random.normal(kv, (1, H), dtype=jnp.float32) * (1.0 / jnp.sqrt(H))

    # Pure-JAX f32 reference (exact PyTorch semantics).
    attn_ref = jax.nn.softmax(jnp.tanh(x @ w_weight.T) @ v_weight.T, axis=1)

    # f32 compute path: tight check (only op-implementation deltas remain).
    attn_f32 = jax.block_until_ready(
        temporal_attention(x, w_weight, v_weight, compute_dtype=jnp.float32))
    assert attn_f32.shape == (B, T, 1)
    assert jnp.allclose(attn_f32, attn_ref, atol=2e-3, rtol=2e-3), \
        float(jnp.max(jnp.abs(attn_f32 - attn_ref)))

    # Default bf16-matmul compute path: looser check (bf16 operand rounding).
    attn_bf16 = jax.block_until_ready(temporal_attention(x, w_weight, v_weight))
    assert attn_bf16.shape == (B, T, 1)
    assert jnp.allclose(attn_bf16, attn_ref, atol=2e-2, rtol=2e-2), \
        float(jnp.max(jnp.abs(attn_bf16 - attn_ref)))

    # ---- Shape 2: force the multi-step grid + batch-tail padding path ----
    B2, T2, H2 = 20, 8, 128
    x2 = jax.random.normal(k2x, (B2, T2, H2), dtype=jnp.float32)
    w2 = jax.random.normal(k2w, (H2, H2), dtype=jnp.float32) * (1.0 / jnp.sqrt(H2))
    v2 = jax.random.normal(k2v, (1, H2), dtype=jnp.float32) * (1.0 / jnp.sqrt(H2))
    ref2 = jax.nn.softmax(jnp.tanh(x2 @ w2.T) @ v2.T, axis=1)
    got2 = jax.block_until_ready(
        temporal_attention(x2, w2, v2, compute_dtype=jnp.float32,
                           block_bytes=32 * 1024))   # small blocks -> 3 grid steps
    assert got2.shape == (B2, T2, 1)
    assert jnp.allclose(got2, ref2, atol=2e-3, rtol=2e-3), \
        float(jnp.max(jnp.abs(got2 - ref2)))

    print("KERNEL_OK")
</pallas_src>

<mosaic_0001>
module attributes {stable_mosaic.version = 11 : i64} {
  func.func @temporal_attention_kernel(%arg0: i32, %arg1: memref<16x32xf32, #tpu.memory_space<vmem>>, %arg2: memref<32x32xf32, #tpu.memory_space<vmem>>, %arg3: memref<1x32xf32, #tpu.memory_space<vmem>>, %arg4: memref<2x8xf32, #tpu.memory_space<vmem>>) attributes {dimension_semantics = [#tpu.dimension_semantics<parallel>], iteration_bounds = array<i64: 1>, scalar_prefetch = 0 : i64, scratch_operands = 0 : i64, tpu.core_type = #tpu.core_type<tc>, window_params = [{transform_indices = @transform_0, window_bounds = array<i64: 16, 32>}, {pipeline_mode = #tpu.pipeline_mode<synchronous>, transform_indices = @transform_1, window_bounds = array<i64: 32, 32>}, {pipeline_mode = #tpu.pipeline_mode<synchronous>, transform_indices = @transform_2, window_bounds = array<i64: 1, 32>}, {transform_indices = @transform_3, window_bounds = array<i64: 2, 8>}]} {
    %c0 = arith.constant 0 : index
    %c0_0 = arith.constant 0 : index
    %0 = vector.load %arg1[%c0, %c0_0] : memref<16x32xf32, #tpu.memory_space<vmem>>, vector<16x32xf32>
    %c0_1 = arith.constant 0 : index
    %c0_2 = arith.constant 0 : index
    %1 = vector.load %arg2[%c0_1, %c0_2] : memref<32x32xf32, #tpu.memory_space<vmem>>, vector<32x32xf32>
    %cst = arith.constant dense<0.000000e+00> : vector<16x32xf32>
    %2 = tpu.matmul %0, %1, %cst {dimension_numbers = #tpu.dot_dimension_numbers<[1], [0], [0], [1], [0, 0, 1, 1], [], []>} : vector<16x32xf32>, vector<32x32xf32>, vector<16x32xf32> -> vector<16x32xf32>
    %3 = math.tanh %2 : vector<16x32xf32>
    %c0_3 = arith.constant 0 : index
    %c0_4 = arith.constant 0 : index
    %4 = vector.load %arg3[%c0_3, %c0_4] : memref<1x32xf32, #tpu.memory_space<vmem>>, vector<1x32xf32>
    %5 = vector.broadcast %4 : vector<1x32xf32> to vector<16x32xf32>
    %6 = arith.mulf %3, %5 : vector<16x32xf32>
    %cst_5 = arith.constant dense<0.000000e+00> : vector<16xf32>
    %7 = vector.multi_reduction <add>, %6, %cst_5 [1] : vector<16x32xf32> to vector<16xf32>
    %8 = vector.shape_cast %7 : vector<16xf32> to vector<16x1xf32>
    %9 = vector.shape_cast %8 : vector<16x1xf32> to vector<2x8xf32>
    %cst_6 = arith.constant dense<0xFF800000> : vector<2xf32>
    %10 = vector.multi_reduction <maximumf>, %9, %cst_6 [1] : vector<2x8xf32> to vector<2xf32>
    %11 = vector.shape_cast %10 : vector<2xf32> to vector<2x1xf32>
    %12 = vector.broadcast %11 : vector<2x1xf32> to vector<2x8xf32>
    %13 = arith.subf %9, %12 : vector<2x8xf32>
    %14 = math.exp %13 : vector<2x8xf32>
    %cst_7 = arith.constant dense<0.000000e+00> : vector<2xf32>
    %15 = vector.multi_reduction <add>, %14, %cst_7 [1] : vector<2x8xf32> to vector<2xf32>
    %16 = vector.shape_cast %15 : vector<2xf32> to vector<2x1xf32>
    %17 = vector.broadcast %16 : vector<2x1xf32> to vector<2x8xf32>
    %18 = arith.divf %14, %17 : vector<2x8xf32>
    %c0_8 = arith.constant 0 : index
    %c0_9 = arith.constant 0 : index
    %19 = vector.load %arg4[%c0_8, %c0_9] : memref<2x8xf32, #tpu.memory_space<vmem>>, vector<2x8xf32>
    tpu.vector_store %arg4[%c0_8, %c0_9], %18 {strides = array<i32>} : memref<2x8xf32, #tpu.memory_space<vmem>>, vector<2x8xf32>,
    return
  }
  func.func @transform_0(%arg0: i32) -> (i32, i32) {
    %c0_i32 = arith.constant 0 : i32
    %c0_i32_0 = arith.constant 0 : i32
    return %arg0, %c0_i32 : i32, i32
  }
  func.func @transform_1(%arg0: i32) -> (i32, i32) {
    %c0_i32 = arith.constant 0 : i32
    %c0_i32_0 = arith.constant 0 : i32
    %c0_i32_1 = arith.constant 0 : i32
    return %c0_i32, %c0_i32_0 : i32, i32
  }
  func.func @transform_2(%arg0: i32) -> (i32, i32) {
    %c0_i32 = arith.constant 0 : i32
    %c0_i32_0 = arith.constant 0 : i32
    %c0_i32_1 = arith.constant 0 : i32
    return %c0_i32, %c0_i32_0 : i32, i32
  }
  func.func @transform_3(%arg0: i32) -> (i32, i32) {
    %c0_i32 = arith.constant 0 : i32
    %c0_i32_0 = arith.constant 0 : i32
    return %arg0, %c0_i32 : i32, i32
  }
}

</mosaic_0001>

<bundles_post_ra>
// kernel: tpu_custom_call.1
= control target key start
LH: loop header
LB: loop body
LE: loop exit
PB: predicated region body
PF: predicated region fallthrough
CT: control target
= control target key end

     0   :  { %8 = vsyncpa [#allocation3], 0  ;;  %s450_s0 = inlined_call_operand.hbm [shape: f32[16,32], index: 0, kind: input, shape index: {}]   ;;  %s451_s1 = inlined_call_operand.hbm [shape: f32[32,32], index: 1, kind: input, shape index: {}]   ;;  %s452_s2 = inlined_call_operand.vmem [shape: f32[1,32], index: 2, kind: input, shape index: {}]   ;;  %s453_s3 = inlined_call_operand.hbm [shape: f32[2,8], index: 3, kind: output, shape index: {}]  }
   0x1   :  { %9 = vsyncpa [#allocation6], 0 }
   0x2   :  { %10 = vsyncpa [#allocation4], 0  ;;  %s375_s12 = smov [#allocation2]   ;;  %s303_s16 = scalar_lea.hbm %s450_s0, 256 }
   0x3   :  { %s16_s13 = sshll.u32 %s375_s12, 4  ;;  %p304_p0 = scmp.ne.s32.totalorder %s450_s0, %s303_s16  ;;  %s17_s13 = int_to_ptr.vmem [resolvable:$true] %s16_s13 }
   0x4   :  { %p307_p1 = scmp.lt.u32.totalorder %s303_s16, %s450_s0 }
   0x6   :  { %p309_p2 = pnand %p307_p1, %p304_p0 }
   0x8   :  { %312 = shalt.err (!%p309_p2)
}
   0x9   :  { %s313_s21 = scalar_lea.vmem %s17_s13, 256  ;;  %p318_p4 = scmp.lt.s32.totalorder %s17_s13, %s17_s13 }
   0xa   :  { %p314_p3 = scmp.ne.s32.totalorder %s17_s13, %s313_s21  ;;  %p319_p5 = scmp.lt.s32.totalorder %s313_s21, %s313_s21 }
   0xc   :  { %p320_p6 = por %p319_p5, %p318_p4 }
   0xe   :  { %p321_p7 = pnand %p320_p6, %p314_p3 }
  0x10   :  { %324 = shalt.err (!%p321_p7)
}
  0x11   :  { %s376_s22 = smov 128   ;;  %s377_s23 = smov 8  }
  0x12   :  { %22 = dma.hbm_to_vmem [thread:$0]  %s450_s0, 256, %s17_s13, [#allocation3], %s376_s22, %s376_s22, %s377_s23  }
  0x13   :  { %s378_s26 = smov [#allocation5]   ;;  %s325_s30 = scalar_lea.hbm %s451_s1, 512 }
  0x14   :  { %s28_s27 = sshll.u32 %s378_s26, 4  ;;  %p326_p8 = scmp.ne.s32.totalorder %s451_s1, %s325_s30  ;;  %s29_s27 = int_to_ptr.vmem [resolvable:$true] %s28_s27 }
  0x15   :  { %p329_p9 = scmp.lt.u32.totalorder %s325_s30, %s451_s1 }
  0x17   :  { %p331_p10 = pnand %p329_p9, %p326_p8 }
  0x19   :  { %334 = shalt.err (!%p331_p10)
}
  0x1a   :  { %s335_s8 = scalar_lea.vmem %s29_s27, 512  ;;  %p340_p12 = scmp.lt.s32.totalorder %s29_s27, %s29_s27 }
  0x1b   :  { %p336_p11 = scmp.ne.s32.totalorder %s29_s27, %s335_s8  ;;  %p341_p13 = scmp.lt.s32.totalorder %s335_s8, %s335_s8 }
  0x1d   :  { %p342_p0 = por %p341_p13, %p340_p12 }
  0x1f   :  { %p343_p1 = pnand %p342_p0, %p336_p11 }
  0x21   :  { %346 = shalt.err (!%p343_p1)
}
  0x22   :  { %34 = dma.hbm_to_vmem [thread:$0]  %s451_s1, 512, %s29_s27, [#allocation6], %s376_s22, %s376_s22, %s377_s23  }
  0x23   :  { %369 = dma.done.wait [#allocation3], 256  }
  0x24   :  { %370 = vsyncadd [#allocation3], 4294967040 }
  0x25   :  { %371 = dma.done.wait [#allocation6], 512  }
  0x26   :  { %372 = vsyncadd [#allocation6], 4294966784  ;;  %vm49_vm0 = vcmask 261120   ;;  %v45_v0 = vld [vmem:[#allocation5] sm:$0xff]  ;;  %v46_v1 = vld [vmem:[#allocation5 + $0x8] sm:$0xff]  ;;  %v150_v17 = vlaneseq  ;;  %vm160_vm1 = vcmask 1041409  }
  0x27   :  { %v47_v2 = vld [vmem:[#allocation5 + $0x10] sm:$0xff]  ;;  %v275_v3 = vpack.c.bf16 %v46_v1, %v45_v0  ;;  %v48_v4 = vld [vmem:[#allocation5 + $0x18] sm:$0xff]  ;;  %vm163_vm2 = vcmask 58368   ;;  %v379_v27 = vmov 0  }
  0x28   :  { %v43_v5 = vld [vmem:[#allocation2] sm:$0xff]  ;;  %v279_v6 = vpack.c.bf16 %v48_v4, %v47_v2  ;;  %v44_v7 = vld [vmem:[#allocation2 + $0x8] sm:$0xff]  ;;  %v151_v18 = vand.u32 127, %v150_v17  ;;  %v153_v19 = vshrl.u32 %v150_v17, 7  ;;  %290 = vset.pattern.permute.xlu0 %v379_v27  ;;  %289 = vset.pattern.permute.xlu1 %v379_v27 }
  0x29   :  { %272 = vmatprep.mubr.msk.f32.mxu0 %vm49_vm0, %v43_v5  ;;  %276 = vmatprep.subr.bf16.mxu0 %v275_v3  ;;  %v257_v10 = vld [vmem:[%s452_s2] ss:$0 sm:$0xff]  ;;  %s380_s2 = smov [#allocation7]  }
  0x2a   :  { %278 = vmatpush3.bf16.msra.mxu0 %v275_v3  ;;  %v154_v21 = vsub.s32 %v151_v18, %v153_v19  ;;  %v170_v28 = vsub.s32 0, %v153_v19  ;;  %v174_v29 = vsub.s32 1, %v153_v19  ;;  %s245_s11 = sshll.u32 %s380_s2, 4  ;;  %s246_s11 = int_to_ptr.vmem [resolvable:$true] %s245_s11 }
  0x2b   :  { %280 = vmatprep.subr.bf16.mxu0 %v279_v6  ;;  %s347_s12 = scalar_lea.vmem %s246_s11, 32  ;;  %p352_p3 = scmp.lt.s32.totalorder %s246_s11, %s246_s11 }
  0x2c   :  { %p348_p2 = scmp.ne.s32.totalorder %s246_s11, %s347_s12  ;;  %p353_p4 = scmp.lt.s32.totalorder %s347_s12, %s347_s12 }
  0x2e   :  { %282 = vmatpush3.bf16.msra.mxu0 %v279_v6  ;;  %p354_p5 = por %p353_p4, %p352_p3 }
  0x30   :  { %p355_p6 = pnand %p354_p5, %p348_p2 }
  0x31   :  { %273 = vmatmul.mubr.msk.f32.vlgmr.msra.gmra.mrb[0].mxu0 %vm49_vm0, %v44_v7 }
 0x104   :  { %v274_v8 = vpop.f32.mrb[0].mxu0 }
 0x105   :  { %291 = vtanh.f32 %v274_v8  ;;  %v122_v9 = vpop.f32.mrb[1].mxu0 }
 0x106   :  { %293 = vtanh.f32 %v122_v9 }
 0x10f   :  { %v292_v11 = vpop.eup %291 }
 0x110   :  { %v294_v12 = vpop.eup %293  ;;  %v141_v15 = vmul.f32 %v292_v11, %v257_v10 }
 0x111   :  { %v140_v13 = vmul.f32 %v294_v12, %v257_v10 }
 0x112   :  { %v145_v16 = vsel %vm49_vm0, %v141_v15, 0.0 }
 0x113   :  { %v142_v14 = vsel %vm49_vm0, %v140_v13, 0.0 }
 0x114   :  { %143 = vadd.xlane.f32.xlu0 %v142_v14 }
 0x118   :  { %146 = vadd.xlane.f32.xlu0 %v145_v16 }
 0x1a1   :  { %v144_v20 = vpop.xlane.xlu0 %143 }
 0x1a2   :  { %v155_v23 = vrot.slane %v144_v20, %v154_v21 }
 0x1a5   :  { %v147_v22 = vpop.xlane.xlu0 %146 }
 0x1a6   :  { %v159_v24 = vrot.slane %v147_v22, %v154_v21 }
 0x1a8   :  { %v161_v25 = vsel %vm160_vm1, %v159_v24, %v155_v23 }
 0x1a9   :  { %v164_v26 = vsel %vm163_vm2, %v161_v25, -inf }
 0x1aa   :  { %165 = vmax.xlane.f32.xlu1 %v164_v26 }
 0x237   :  { %v166_v30 = vpop.xlane.xlu1 %165 }
 0x238   :  { %v171_v31 = vrot.slane %v166_v30, %v170_v28  ;;  %v175_v32 = vrot.slane %v166_v30, %v174_v29 }
 0x23a   :  { %v178_v33 = vsub.f32 %v144_v20, %v171_v31  ;;  %v179_v34 = vsub.f32 %v147_v22, %v175_v32 }
 0x23c   :  { %v180_v35 = vmul.f32 1.442695, %v178_v33  ;;  %v182_v36 = vmul.f32 1.442695, %v179_v34 }
 0x23e   :  { %295 = vpow2.f32 %v180_v35 }
 0x23f   :  { %297 = vpow2.f32 %v182_v36 }
 0x248   :  { %v296_v37 = vpop.eup %295 }
 0x249   :  { %v298_v38 = vpop.eup %297  ;;  %187 = vperm.xlu1 %289, %v296_v37  }
 0x24a   :  { %190 = vperm.xlu0 %290, %v298_v38  }
 0x2c8   :  { %v188_v39 = vpop.permute.xlu1 %187 }
 0x2c9   :  { %v191_v40 = vpop.permute.xlu0 %190  ;;  %v195_v41 = vrot.slane %v188_v39, %v154_v21 }
 0x2ca   :  { %v199_v42 = vrot.slane %v191_v40, %v154_v21 }
 0x2cc   :  { %v200_v43 = vsel %vm160_vm1, %v199_v42, %v195_v41 }
 0x2cd   :  { %v202_v44 = vsel %vm163_vm2, %v200_v43, 0.0 }
 0x2ce   :  { %203 = vadd.xlane.f32.xlu1 %v202_v44 }
 0x35b   :  { %v204_v45 = vpop.xlane.xlu1 %203 }
 0x35c   :  { %v209_v46 = vrot.slane %v204_v45, %v170_v28  ;;  %v213_v47 = vrot.slane %v204_v45, %v174_v29 }
 0x35e   :  { %299 = vrcp.f32 %v209_v46 }
 0x35f   :  { %301 = vrcp.f32 %v213_v47 }
 0x368   :  { %v300_v48 = vpop.eup %299 }
 0x369   :  { %v217_v49 = vmul.f32 %v300_v48, %v296_v37  ;;  %v302_v50 = vpop.eup %301 }
 0x36a   :  { %v219_v51 = vmul.f32 %v302_v50, %v298_v38 }
 0x36b   :  { %223 = vperm.xlu0 %290, %v217_v49  }
 0x36f   :  { %226 = vperm.xlu0 %290, %v219_v51  }
 0x3ea   :  { %v224_v52 = vpop.permute.xlu0 %223 }
 0x3eb   :  { %v231_v54 = vrot.slane %v224_v52, %v154_v21 }
 0x3ee   :  { %v227_v53 = vpop.permute.xlu0 %226 }
 0x3ef   :  { %v235_v55 = vrot.slane %v227_v53, %v154_v21 }
 0x3f1   :  { %v236_v56 = vsel %vm160_vm1, %v235_v55, %v231_v54 }
 0x3f2   :  { %238 = vst.msk [vmem:[#allocation7] sm:$0x3] %vm163_vm2, %v236_v56 }
 0x3f3   :  { %358 = shalt.err (!%p355_p6)
}
 0x3f4   :  { %s359_s15 = scalar_lea.hbm %s453_s3, 32 }
 0x3f5   :  { %p360_p7 = scmp.ne.s32.totalorder %s453_s3, %s359_s15  ;;  %p363_p8 = scmp.lt.u32.totalorder %s359_s15, %s453_s3 }
 0x3f7   :  { %p365_p9 = pnand %p363_p8, %p360_p7 }
 0x3f9   :  { %368 = shalt.err (!%p365_p9)
}
 0x3fa   :  { %248 = dma.vmem_to_hbm [thread:$0]  %s246_s11, 32, %s453_s3, [#allocation4]  }
 0x3fb   :  { %373 = dma.done.wait [#allocation4], 32  }
 0x3fc   :  { %374 = vsyncadd [#allocation4], 4294967264 }
 0x3fd   :  { %252 = vsyncpa [#allocation3], 1 }
 0x3fe   :  { %253 = vsyncpa [#allocation6], 1 }
 0x3ff   :  { %254 = vsyncpa [#allocation4], 1 }

</bundles_post_ra>
